<compile_context>
chip_gen: v6e
topology: v6e:2x2x1
jax: 0.10.0
libtpu: 0.0.40
codegen_flags: <defaults>
</compile_context>

<pallas_src>
import functools

import jax
import jax.numpy as jnp
from jax.experimental import pallas as pl
from jax.experimental.pallas import tpu as pltpu


def _round_up(a, b):
    return (a + b - 1) // b * b


def _vmem_capacity_bytes():
    """Physical VMEM of the local TPU generation; conservative fallback (v7x per-TC)."""
    try:
        info = pltpu.get_tpu_info()
        cap = getattr(info, "vmem_capacity_bytes", None)
        if cap:
            return int(cap)
    except Exception:
        pass
    return 64 * 1024 * 1024


def _mxu_contract_depth():
    """Best-effort MXU contraction depth: 256 on v6e/v7x, 128 on <=v5 (default 256)."""
    try:
        info = pltpu.get_tpu_info()
        name = str(getattr(info, "chip_version", "")).lower()
        if name:
            if ("6" in name) or ("7" in name):
                return 256
            return 128
    except Exception:
        pass
    return 256


def _choose_t_tile(T, C, x_itemsize, mm_itemsize, K, stack_taps, sub):
    """Largest time tile (multiple of `sub`, capped at 512 rows) whose double-buffered I/O
    tiles + scratch + grid-invariant weights fit comfortably in this generation's VMEM.
    Prefers a divisor of T so no ragged padding is needed."""
    cpad = _round_up(C, 128)                 # lanes are 128 wide: C < 128 still costs 128
    cap_bytes = _vmem_capacity_bytes()
    # Grid-invariant VMEM residents (constant index maps): conv weight + bias/gamma/beta.
    resident = K * C * cpad * mm_itemsize + 3 * cpad * 4
    budget = max(cap_bytes // 3 - resident, 1 << 20)
    # Bytes per time-row that scale with the tile size.
    per_row = cpad * (
        2 * x_itemsize                       # input tile, double buffered
        + 2 * x_itemsize                     # output tile, double buffered
        + mm_itemsize                        # causal window scratch
        + 12                                 # f32 accumulator + LayerNorm temporaries
        + (K * mm_itemsize if stack_taps else 0))   # stacked activation
    cap_rows = max(sub, budget // per_row)
    cap_rows = int(min(cap_rows, 512))       # HBM roofline saturates by ~512 rows
    tt = min(_round_up(T, sub), (cap_rows // sub) * sub)
    tt = max(tt, sub)
    if T % tt != 0:                          # prefer a divisor of T (avoids ragged padding)
        for cand in range(tt, sub - 1, -sub):
            if T % cand == 0:
                return cand
    return tt


def _residual_block_kernel(xt_ref, w_ref, b_ref, g_ref, beta_ref, out_ref, xwin_ref, *,
                           t_tile, pad, K, dilation, eps, stack_taps):
    """One (batch, time-tile) grid step.

    xt_ref   : (1, t_tile, C)   current input tile (conv body AND residual)
    w_ref    : (K*C, C)         conv weight, rows ordered (k, c_in)   (grid-invariant)
    b/g/beta : (1, C)
    out_ref  : (1, t_tile, C)
    xwin_ref : (pad + t_tile, C) VMEM causal window in the matmul dtype.
               Rows [0, pad) persist across time tiles and carry the causal halo
               (the last `pad` input rows seen so far); rows [pad, pad+t_tile)
               hold the current tile.
    """
    C = xt_ref.shape[-1]
    t = pl.program_id(1)

    if pad > 0:
        @pl.when(t == 0)
        def _zero_halo():
            # First time tile of a batch: the causal left padding is zeros.
            xwin_ref[pl.ds(0, pad), :] = jnp.zeros((pad, C), xwin_ref.dtype)

    x_tile = xt_ref[0]
    # Stage the tile behind the halo, casting to the matmul dtype exactly once.
    xwin_ref[pl.ds(pad, t_tile), :] = x_tile.astype(xwin_ref.dtype)

    # Dilated causal conv: y[t, o] = sum_k sum_i win[t + k*d, i] * w[k*C + i, o]
    if stack_taps:
        # Fuse the K taps into one matmul with contraction K*C (fills the MXU depth).
        stacked = jnp.concatenate(
            [xwin_ref[pl.ds(k * dilation, t_tile), :] for k in range(K)], axis=-1)
        acc = jnp.dot(stacked, w_ref[...], preferred_element_type=jnp.float32)
    else:
        acc = jnp.zeros((t_tile, C), jnp.float32)
        for k in range(K):  # static unroll, K is small
            acc = acc + jnp.dot(xwin_ref[pl.ds(k * dilation, t_tile), :],
                                w_ref[pl.ds(k * C, C), :],
                                preferred_element_type=jnp.float32)
    acc = acc + b_ref[...].astype(jnp.float32)

    # LayerNorm over channels: two-pass statistics in f32 (no cancellation).
    inv_c = 1.0 / C
    mean = jnp.sum(acc, axis=-1, keepdims=True) * inv_c
    cent = acc - mean
    var = jnp.sum(cent * cent, axis=-1, keepdims=True) * inv_c
    normed = cent * jax.lax.rsqrt(var + eps)
    normed = normed * g_ref[...].astype(jnp.float32) + beta_ref[...].astype(jnp.float32)

    # ReLU, dropout (identity in eval mode), residual add.
    # TODO(synk): training-mode dropout RNG masking not implemented (eval-mode identity).
    out = jnp.maximum(normed, 0.0)
    out_ref[0] = (out + x_tile.astype(jnp.float32)).astype(out_ref.dtype)

    if pad > 0:
        # Carry: the last `pad` rows of the window become the next tile's causal halo
        # (zeroed again at t == 0, so batch boundaries are handled).
        xwin_ref[pl.ds(0, pad), :] = xwin_ref[pl.ds(t_tile, pad), :]


def residual_block(x, conv_w_torch, conv_b, ln_gamma, ln_beta, *,
                   kernel_size, dilation, eps=1e-5, t_tile=None, matmul_dtype=None):
    """Pallas TPU forward of ResidualBlock (eval mode).

    x            : (B, T, C).  Pass bf16 x for bf16 end-to-end I/O (halves HBM bytes);
                   LayerNorm / ReLU / accumulation stay in f32 inside the kernel.
    conv_w_torch : (C_out, C_in, K)  -- PyTorch nn.Conv1d layout.
    conv_b, ln_gamma, ln_beta : (C,)
    """
    B, T, C = x.shape
    K = kernel_size
    pad = (K - 1) * dilation
    x_dtype = jnp.dtype(x.dtype)
    cap_bytes = _vmem_capacity_bytes()
    cpad = _round_up(C, 128)

    if matmul_dtype is None:
        mm_dtype = x_dtype
        # Force bf16 matmul operands when the grid-invariant f32 weight block would eat a
        # large slice of VMEM (e.g. C=2048, K=3 f32 is 48 MiB -- critical on v7x's 64 MiB).
        if mm_dtype == jnp.float32 and K * C * cpad * 4 > cap_bytes // 4:
            mm_dtype = jnp.dtype(jnp.bfloat16)
    else:
        mm_dtype = jnp.dtype(matmul_dtype)
    mm_itemsize = mm_dtype.itemsize
    x_itemsize = x_dtype.itemsize

    # Stack the K taps into one matmul whenever the fused contraction fits one MXU pass
    # (256-deep on v6e/v7x, 128 on v5e) or the per-tap contraction underfills it anyway.
    stack_taps = (C < 128) or (K * C <= _mxu_contract_depth())

    # Dtype-aware sublane alignment for the time axis (8 rows f32, 16 bf16, 32 int8/fp8).
    sub = max(8, 32 // x_itemsize, 32 // mm_itemsize)

    if t_tile is None:
        t_tile = _choose_t_tile(T, C, x_itemsize, mm_itemsize, K, stack_taps, sub)
    else:
        assert t_tile % sub == 0, f"t_tile must be a multiple of {sub} for dtype {x_dtype}"

    # Ragged T: zero-pad the time axis up to a tile multiple (trailing zero rows can never
    # influence earlier outputs of a causal conv) and slice the output back to T.
    T_pad = _round_up(T, t_tile)
    x_in = x if T_pad == T else jnp.pad(x, ((0, 0), (0, T_pad - T), (0, 0)))
    num_t = T_pad // t_tile

    # (C_out, C_in, K) -> (K, C_in, C_out) -> (K*C_in, C_out), matmul dtype.
    w_arg = jnp.transpose(conv_w_torch, (2, 1, 0)).astype(mm_dtype).reshape(K * C, C)
    w_spec = pl.BlockSpec((K * C, C), lambda b, t: (0, 0))

    kernel = functools.partial(
        _residual_block_kernel, t_tile=t_tile, pad=pad, K=K, dilation=dilation,
        eps=eps, stack_taps=stack_taps)

    # Truthful VMEM budget: double-buffered I/O tiles + window + residents + f32 temps,
    # with 2x headroom, instead of a blanket 100 MiB that starves surrounding fusions.
    footprint = (
        2 * t_tile * cpad * x_itemsize            # input tile (double buffered)
        + 2 * t_tile * cpad * x_itemsize          # output tile (double buffered)
        + (pad + t_tile) * cpad * mm_itemsize     # causal window scratch
        + K * C * cpad * mm_itemsize              # conv weight (grid-invariant)
        + 3 * cpad * 4                            # bias / gamma / beta
        + 3 * t_tile * cpad * 4                   # f32 accumulator + LayerNorm temporaries
        + (t_tile * _round_up(K * C, 128) * mm_itemsize if stack_taps else 0))
    vmem_limit = int(min(0.9 * cap_bytes,
                         max(24 * 1024 * 1024, 2 * footprint + 4 * 1024 * 1024)))

    out = pl.pallas_call(
        kernel,
        out_shape=jax.ShapeDtypeStruct((B, T_pad, C), x_dtype),
        grid=(B, num_t),
        in_specs=[
            pl.BlockSpec((1, t_tile, C), lambda b, t: (b, t, 0)),  # x tile: conv body + residual
            w_spec,                                                # conv weight (VMEM-resident)
            pl.BlockSpec((1, C), lambda b, t: (0, 0)),             # conv bias
            pl.BlockSpec((1, C), lambda b, t: (0, 0)),             # ln gamma
            pl.BlockSpec((1, C), lambda b, t: (0, 0)),             # ln beta
        ],
        out_specs=pl.BlockSpec((1, t_tile, C), lambda b, t: (b, t, 0)),
        scratch_shapes=[
            pltpu.VMEM((pad + t_tile, C), mm_dtype),   # causal window (halo carry + tile)
        ],
        compiler_params=pltpu.CompilerParams(
            # Time axis carries the causal halo in scratch -> sequential ("arbitrary");
            # batch axis stays "parallel" so v7x megacore shards over B.
            # TODO(synk): for B == 1 on v7x, a halo-DMA variant would let the time axis
            # stay "parallel" across the two TensorCores.
            dimension_semantics=("parallel", "arbitrary"),
            vmem_limit_bytes=vmem_limit),
    )(x_in, w_arg, conv_b.reshape(1, C), ln_gamma.reshape(1, C), ln_beta.reshape(1, C))

    return out if T_pad == T else out[:, :T, :]


def residual_block_reference(x, conv_w_torch, conv_b, ln_gamma, ln_beta,
                             *, kernel_size, dilation, eps=1e-5):
    """Pure-JAX reference matching the PyTorch forward (eval mode)."""
    B, T, C = x.shape
    pad = (kernel_size - 1) * dilation
    xp = jnp.pad(x, ((0, 0), (pad, 0), (0, 0)))
    out = jnp.zeros((B, T, C), jnp.float32)
    for k in range(kernel_size):
        out = out + jnp.einsum('btc,oc->bto',
                               xp[:, k * dilation:k * dilation + T, :],
                               conv_w_torch[:, :, k])
    out = out + conv_b
    mean = out.mean(-1, keepdims=True)
    var = ((out - mean) ** 2).mean(-1, keepdims=True)
    normed = (out - mean) / jnp.sqrt(var + eps) * ln_gamma + ln_beta
    return jnp.maximum(normed, 0.0) + x


if __name__ == "__main__":
    key = jax.random.PRNGKey(0)
    (kx, kw, kb, kg, kbe, kx_rag, kx2, kw2, kb2, kg2, kbe2) = jax.random.split(key, 11)

    # --- Case 1: small channels (stacked-tap MXU path), single and multi-tile (halo carry).
    B, T, C = 2, 64, 32
    kernel_size, dilation = 3, 2
    x = jax.random.normal(kx, (B, T, C), jnp.float32)
    conv_w = jax.random.normal(kw, (C, C, kernel_size), jnp.float32) * 0.1
    conv_b = jax.random.normal(kb, (C,), jnp.float32) * 0.1
    ln_gamma = 1.0 + 0.05 * jax.random.normal(kg, (C,), jnp.float32)
    ln_beta = 0.05 * jax.random.normal(kbe, (C,), jnp.float32)

    ref = residual_block_reference(x, conv_w, conv_b, ln_gamma, ln_beta,
                                   kernel_size=kernel_size, dilation=dilation)

    out_auto = jax.block_until_ready(residual_block(
        x, conv_w, conv_b, ln_gamma, ln_beta, kernel_size=kernel_size, dilation=dilation))
    assert out_auto.shape == (B, T, C)
    assert jnp.allclose(out_auto, ref, atol=1e-4, rtol=1e-4), "auto-tile mismatch vs reference"

    out_tiled = jax.block_until_ready(residual_block(
        x, conv_w, conv_b, ln_gamma, ln_beta, kernel_size=kernel_size, dilation=dilation,
        t_tile=16))
    assert jnp.allclose(out_tiled, ref, atol=1e-4, rtol=1e-4), "tiled (halo-carry) mismatch"

    # --- Case 2: bf16 end-to-end I/O (the HBM-bandwidth win), f32 math inside.
    x_bf = x.astype(jnp.bfloat16)
    ref_bf = residual_block_reference(x_bf.astype(jnp.float32), conv_w, conv_b, ln_gamma,
                                      ln_beta, kernel_size=kernel_size, dilation=dilation)
    out_bf = jax.block_until_ready(residual_block(
        x_bf, conv_w, conv_b, ln_gamma, ln_beta, kernel_size=kernel_size, dilation=dilation,
        t_tile=16))
    assert out_bf.dtype == jnp.bfloat16
    assert jnp.allclose(out_bf.astype(jnp.float32), ref_bf, atol=1e-1, rtol=1e-1), \
        "bf16 end-to-end mismatch vs reference"

    # --- Case 3: ragged T (not a multiple of the tile) -> wrapper-side zero pad + slice.
    T_rag = 60
    x_rag = jax.random.normal(kx_rag, (B, T_rag, C), jnp.float32)
    ref_rag = residual_block_reference(x_rag, conv_w, conv_b, ln_gamma, ln_beta,
                                       kernel_size=kernel_size, dilation=dilation)
    out_rag = jax.block_until_ready(residual_block(
        x_rag, conv_w, conv_b, ln_gamma, ln_beta, kernel_size=kernel_size, dilation=dilation,
        t_tile=16))
    assert out_rag.shape == (B, T_rag, C)
    assert jnp.allclose(out_rag, ref_rag, atol=1e-4, rtol=1e-4), "ragged-T mismatch"

    # --- Case 4: C = 128, K*C = 384 > 256 -> per-tap matmul path (non-stacked taps).
    B2, T2, C2 = 1, 32, 128
    ks2, dil2 = 3, 1
    x2 = jax.random.normal(kx2, (B2, T2, C2), jnp.float32)
    conv_w2 = jax.random.normal(kw2, (C2, C2, ks2), jnp.float32) * 0.05
    conv_b2 = jax.random.normal(kb2, (C2,), jnp.float32) * 0.1
    ln_gamma2 = 1.0 + 0.05 * jax.random.normal(kg2, (C2,), jnp.float32)
    ln_beta2 = 0.05 * jax.random.normal(kbe2, (C2,), jnp.float32)
    ref2 = residual_block_reference(x2, conv_w2, conv_b2, ln_gamma2, ln_beta2,
                                    kernel_size=ks2, dilation=dil2)
    out2 = jax.block_until_ready(residual_block(
        x2, conv_w2, conv_b2, ln_gamma2, ln_beta2, kernel_size=ks2, dilation=dil2))
    assert jnp.allclose(out2, ref2, atol=1e-3, rtol=1e-3), "per-tap path mismatch vs reference"

    print("KERNEL_OK")
</pallas_src>

<mosaic_0001>
module attributes {stable_mosaic.version = 11 : i64} {
  func.func @_residual_block_kernel(%arg0: i32, %arg1: i32, %arg2: memref<1x64x32xf32, #tpu.memory_space<vmem>>, %arg3: memref<96x32xf32, #tpu.memory_space<vmem>>, %arg4: memref<1x32xf32, #tpu.memory_space<vmem>>, %arg5: memref<1x32xf32, #tpu.memory_space<vmem>>, %arg6: memref<1x32xf32, #tpu.memory_space<vmem>>, %arg7: memref<1x64x32xf32, #tpu.memory_space<vmem>>, %arg8: memref<68x32xf32, #tpu.memory_space<vmem>>) attributes {dimension_semantics = [#tpu.dimension_semantics<parallel>, #tpu.dimension_semantics<arbitrary>], iteration_bounds = array<i64: 2, 1>, scalar_prefetch = 0 : i64, scratch_operands = 1 : i64, tpu.core_type = #tpu.core_type<tc>, window_params = [{transform_indices = @transform_0, window_bounds = array<i64: 1, 64, 32>}, {pipeline_mode = #tpu.pipeline_mode<synchronous>, transform_indices = @transform_1, window_bounds = array<i64: 96, 32>}, {pipeline_mode = #tpu.pipeline_mode<synchronous>, transform_indices = @transform_2, window_bounds = array<i64: 1, 32>}, {pipeline_mode = #tpu.pipeline_mode<synchronous>, transform_indices = @transform_3, window_bounds = array<i64: 1, 32>}, {pipeline_mode = #tpu.pipeline_mode<synchronous>, transform_indices = @transform_4, window_bounds = array<i64: 1, 32>}, {transform_indices = @transform_5, window_bounds = array<i64: 1, 64, 32>}]} {
    %c0_i32 = arith.constant 0 : i32
    %0 = arith.cmpi eq, %arg1, %c0_i32 : i32
    %1 = arith.extui %0 : i1 to i32
    %c0_i32_0 = arith.constant 0 : i32
    %2 = arith.cmpi ne, %1, %c0_i32_0 : i32
    scf.if %2 {
      %cst_29 = arith.constant 0.000000e+00 : f32
      %45 = vector.broadcast %cst_29 : f32 to vector<4x32xf32>
      %c0_30 = arith.constant 0 : index
      %c0_31 = arith.constant 0 : index
      %46 = vector.load %arg8[%c0_30, %c0_31] : memref<68x32xf32, #tpu.memory_space<vmem>>, vector<4x32xf32>
      tpu.vector_store %arg8[%c0_30, %c0_31], %45 {strides = array<i32>} : memref<68x32xf32, #tpu.memory_space<vmem>>, vector<4x32xf32>,
    } else {
    }
    %c0 = arith.constant 0 : index
    %c0_1 = arith.constant 0 : index
    %c0_2 = arith.constant 0 : index
    %3 = vector.load %arg2[%c0, %c0_1, %c0_2] : memref<1x64x32xf32, #tpu.memory_space<vmem>>, vector<1x64x32xf32>
    %4 = vector.shape_cast %3 : vector<1x64x32xf32> to vector<64x32xf32>
    %c4 = arith.constant 4 : index
    %c0_3 = arith.constant 0 : index
    %5 = vector.load %arg8[%c4, %c0_3] : memref<68x32xf32, #tpu.memory_space<vmem>>, vector<64x32xf32>
    tpu.vector_store %arg8[%c4, %c0_3], %4 {strides = array<i32>} : memref<68x32xf32, #tpu.memory_space<vmem>>, vector<64x32xf32>,
    %c0_4 = arith.constant 0 : index
    %c0_5 = arith.constant 0 : index
    %6 = vector.load %arg8[%c0_4, %c0_5] : memref<68x32xf32, #tpu.memory_space<vmem>>, vector<64x32xf32>
    %c2 = arith.constant 2 : index
    %c0_6 = arith.constant 0 : index
    %7 = vector.load %arg8[%c2, %c0_6] : memref<68x32xf32, #tpu.memory_space<vmem>>, vector<64x32xf32>
    %c4_7 = arith.constant 4 : index
    %c0_8 = arith.constant 0 : index
    %8 = vector.load %arg8[%c4_7, %c0_8] : memref<68x32xf32, #tpu.memory_space<vmem>>, vector<64x32xf32>
    %9 = tpu.concatenate %6, %7, %8 in 1 : vector<64x32xf32>, vector<64x32xf32>, vector<64x32xf32> -> vector<64x96xf32>
    %c0_9 = arith.constant 0 : index
    %c0_10 = arith.constant 0 : index
    %10 = vector.load %arg3[%c0_9, %c0_10] : memref<96x32xf32, #tpu.memory_space<vmem>>, vector<96x32xf32>
    %cst = arith.constant dense<0.000000e+00> : vector<64x32xf32>
    %11 = tpu.matmul %9, %10, %cst {dimension_numbers = #tpu.dot_dimension_numbers<[1], [0], [0], [1], [0, 0, 1, 1], [], []>} : vector<64x96xf32>, vector<96x32xf32>, vector<64x32xf32> -> vector<64x32xf32>
    %c0_11 = arith.constant 0 : index
    %c0_12 = arith.constant 0 : index
    %12 = vector.load %arg4[%c0_11, %c0_12] : memref<1x32xf32, #tpu.memory_space<vmem>>, vector<1x32xf32>
    %13 = vector.broadcast %12 : vector<1x32xf32> to vector<64x32xf32>
    %14 = arith.addf %11, %13 : vector<64x32xf32>
    %cst_13 = arith.constant dense<0.000000e+00> : vector<64xf32>
    %15 = vector.multi_reduction <add>, %14, %cst_13 [1] : vector<64x32xf32> to vector<64xf32>
    %16 = vector.shape_cast %15 : vector<64xf32> to vector<64x1xf32>
    %cst_14 = arith.constant 3.125000e-02 : f32
    %17 = vector.broadcast %cst_14 : f32 to vector<64x1xf32>
    %18 = arith.mulf %16, %17 : vector<64x1xf32>
    %19 = vector.broadcast %18 : vector<64x1xf32> to vector<64x32xf32>
    %20 = arith.subf %14, %19 : vector<64x32xf32>
    %21 = arith.mulf %20, %20 : vector<64x32xf32>
    %cst_15 = arith.constant dense<0.000000e+00> : vector<64xf32>
    %22 = vector.multi_reduction <add>, %21, %cst_15 [1] : vector<64x32xf32> to vector<64xf32>
    %23 = vector.shape_cast %22 : vector<64xf32> to vector<64x1xf32>
    %cst_16 = arith.constant 3.125000e-02 : f32
    %24 = vector.broadcast %cst_16 : f32 to vector<64x1xf32>
    %25 = arith.mulf %23, %24 : vector<64x1xf32>
    %cst_17 = arith.constant 9.99999974E-6 : f32
    %26 = vector.broadcast %cst_17 : f32 to vector<64x1xf32>
    %27 = arith.addf %25, %26 : vector<64x1xf32>
    %28 = math.rsqrt %27 : vector<64x1xf32>
    %29 = vector.broadcast %28 : vector<64x1xf32> to vector<64x32xf32>
    %30 = arith.mulf %20, %29 : vector<64x32xf32>
    %c0_18 = arith.constant 0 : index
    %c0_19 = arith.constant 0 : index
    %31 = vector.load %arg5[%c0_18, %c0_19] : memref<1x32xf32, #tpu.memory_space<vmem>>, vector<1x32xf32>
    %32 = vector.broadcast %31 : vector<1x32xf32> to vector<64x32xf32>
    %33 = arith.mulf %30, %32 : vector<64x32xf32>
    %c0_20 = arith.constant 0 : index
    %c0_21 = arith.constant 0 : index
    %34 = vector.load %arg6[%c0_20, %c0_21] : memref<1x32xf32, #tpu.memory_space<vmem>>, vector<1x32xf32>
    %35 = vector.broadcast %34 : vector<1x32xf32> to vector<64x32xf32>
    %36 = arith.addf %33, %35 : vector<64x32xf32>
    %cst_22 = arith.constant 0.000000e+00 : f32
    %37 = vector.broadcast %cst_22 : f32 to vector<64x32xf32>
    %38 = arith.maximumf %36, %37 : vector<64x32xf32>
    %39 = arith.addf %38, %4 : vector<64x32xf32>
    %c0_23 = arith.constant 0 : index
    %c0_24 = arith.constant 0 : index
    %c0_25 = arith.constant 0 : index
    %40 = vector.load %arg7[%c0_23, %c0_24, %c0_25] : memref<1x64x32xf32, #tpu.memory_space<vmem>>, vector<1x64x32xf32>
    %41 = vector.shape_cast %40 : vector<1x64x32xf32> to vector<64x32xf32>
    %42 = vector.shape_cast %39 : vector<64x32xf32> to vector<1x64x32xf32>
    tpu.vector_store %arg7[%c0_23, %c0_24, %c0_25], %42 {strides = array<i32>} : memref<1x64x32xf32, #tpu.memory_space<vmem>>, vector<1x64x32xf32>,
    %c64 = arith.constant 64 : index
    %c0_26 = arith.constant 0 : index
    %43 = vector.load %arg8[%c64, %c0_26] : memref<68x32xf32, #tpu.memory_space<vmem>>, vector<4x32xf32>
    %c0_27 = arith.constant 0 : index
    %c0_28 = arith.constant 0 : index
    %44 = vector.load %arg8[%c0_27, %c0_28] : memref<68x32xf32, #tpu.memory_space<vmem>>, vector<4x32xf32>
    tpu.vector_store %arg8[%c0_27, %c0_28], %43 {strides = array<i32>} : memref<68x32xf32, #tpu.memory_space<vmem>>, vector<4x32xf32>,
    return
  }
  func.func @transform_0(%arg0: i32, %arg1: i32) -> (i32, i32, i32) {
    %c0_i32 = arith.constant 0 : i32
    %c0_i32_0 = arith.constant 0 : i32
    return %arg0, %arg1, %c0_i32 : i32, i32, i32
  }
  func.func @transform_1(%arg0: i32, %arg1: i32) -> (i32, i32) {
    %c0_i32 = arith.constant 0 : i32
    %c0_i32_0 = arith.constant 0 : i32
    %c0_i32_1 = arith.constant 0 : i32
    return %c0_i32, %c0_i32_0 : i32, i32
  }
  func.func @transform_2(%arg0: i32, %arg1: i32) -> (i32, i32) {
    %c0_i32 = arith.constant 0 : i32
    %c0_i32_0 = arith.constant 0 : i32
    %c0_i32_1 = arith.constant 0 : i32
    return %c0_i32, %c0_i32_0 : i32, i32
  }
  func.func @transform_3(%arg0: i32, %arg1: i32) -> (i32, i32) {
    %c0_i32 = arith.constant 0 : i32
    %c0_i32_0 = arith.constant 0 : i32
    %c0_i32_1 = arith.constant 0 : i32
    return %c0_i32, %c0_i32_0 : i32, i32
  }
  func.func @transform_4(%arg0: i32, %arg1: i32) -> (i32, i32) {
    %c0_i32 = arith.constant 0 : i32
    %c0_i32_0 = arith.constant 0 : i32
    %c0_i32_1 = arith.constant 0 : i32
    return %c0_i32, %c0_i32_0 : i32, i32
  }
  func.func @transform_5(%arg0: i32, %arg1: i32) -> (i32, i32, i32) {
    %c0_i32 = arith.constant 0 : i32
    %c0_i32_0 = arith.constant 0 : i32
    return %arg0, %arg1, %c0_i32 : i32, i32, i32
  }
}

</mosaic_0001>

<bundles_post_ra>
// kernel: tpu_custom_call.1
= control target key start
LH: loop header
LB: loop body
LE: loop exit
PB: predicated region body
PF: predicated region fallthrough
CT: control target
= control target key end

     0   :  { %s993_s18 = smov 0   ;;  %s995_s19 = smov 0   ;;  %s1234_s0 = inlined_call_operand.vmem [shape: f32[2,64,32], index: 0, kind: input, shape index: {}]   ;;  %s1235_s1 = inlined_call_operand.vmem [shape: f32[96,32], index: 1, kind: input, shape index: {}]   ;;  %s1236_s2 = inlined_call_operand.vmem [shape: f32[1,32], index: 2, kind: input, shape index: {}]   ;;  %s1237_s3 = inlined_call_operand.vmem [shape: f32[1,32], index: 3, kind: input, shape index: {}]   ;;  %s1238_s4 = inlined_call_operand.vmem [shape: f32[1,32], index: 4, kind: input, shape index: {}]   ;;  %s1239_s5 = inlined_call_operand.vmem [shape: f32[2,64,32], index: 5, kind: output, shape index: {}]  }
   0x1   :  { %s997_s20 = smov 0  }
   0x2 LB: > { %s27_s21 = sadd.s32 1, %s954_s19  ;;  %p793_p0 = scmp.ge.s32.totalorder %s958_s20, 1  ;;  %s958_s20 = sphi %s997_s20, %s15_s20   ;;  %s954_s19 = sphi %s995_s19, %s1241_s19   ;;  %s950_s18 = sphi %s993_s18, %s1240_s18  }
   0x3   : > { %p29_p1 = scmp.ge.s32.totalorder %s27_s21, 2  ;;  %p208_p2 = scmp.lt.s32.totalorder %s958_s20, 3 }
   0x5   : > { %s1243_s21 = smov (%p29_p1, %s27_s21), 0  ;;  %p209_p3 = pnand %p793_p0, %p208_p2 }
   0x6   : > { %p245_p4 = scmp.lt.s32.totalorder (!%p209_p3), %s950_s18, 1  ;;  %s961_s17 = smov (!%p209_p3), 32  }
   0x7   : > { %212 = sbr.rel (%p209_p3) target bundleno = 688 (0x2b0), region = 40  ;;  %s962_s29 = smov (!%p209_p3), 64  }
   0xc   : > { %vm268_vm0 = vcmask 257024   ;;  %v403_v0 = vld [vmem:[%s1235_s1 + $0x58] sm:$0xff]  ;;  %v960_v1 = vmov 0.0   ;;  %v402_v2 = vld [vmem:[%s1235_s1 + $0x50] sm:$0xff]  ;;  %s1245_s18 = smov (!%p245_p4, %s950_s18), 1  ;;  %v401_v3 = vld [vmem:[%s1235_s1 + $0x48] sm:$0xff] }
   0xd   : > { %269 = vst.msk [vmem:[#allocation2] sm:$0xf] %vm268_vm0, %v960_v1  ;;  %833 = vmatprep.subr.mxu0 %v403_v0  ;;  %869 = vmatprep.subr.mxu1 %v403_v0  ;;  %s811_s28 = sshll.u32 %s1245_s18, 6  ;;  %vm278_vm1 = vcmask 261120   ;;  %v400_v4 = vld [vmem:[%s1235_s1 + $0x40] sm:$0xff]  ;;  %v399_v5 = vld [vmem:[%s1235_s1 + $0x38] sm:$0xff] }
   0xe   : > { %834 = vmatpush3.msra.mxu0 %v403_v0  ;;  %881 = vmatpush3.msra.mxu1 %v403_v0  ;;  %s252_s8 = scalar_lea.vmem %s1234_s0, %s811_s28  ;;  %v398_v14 = vld [vmem:[%s1235_s1 + $0x30] sm:$0xff]  ;;  %v397_v15 = vld [vmem:[%s1235_s1 + $0x28] sm:$0xff]  ;;  %v396_v16 = vld [vmem:[%s1235_s1 + $0x20] sm:$0xff]  ;;  %vm383_vm2 = vcmask 523264   ;;  %vm411_vm3 = vcmask 785408   ;;  %s1194_s15 = scalar_lea.vmem %s1239_s5, %s811_s28 }
   0xf   : > { %835 = vmatprep.subr.mxu0 %v402_v2  ;;  %870 = vmatprep.subr.mxu1 %v402_v2  ;;  %v1035_v6 = vld [vmem:[%s252_s8] sm:$0xff]  ;;  %v1037_v7 = vld [vmem:[%s252_s8 + $0x8] sm:$0xff]  ;;  %v1049_v10 = vld [vmem:[%s252_s8 + $0x18] sm:$0xff] }
  0x10   : > { %836 = vmatpush3.msra.mxu0 %v402_v2  ;;  %882 = vmatpush3.msra.mxu1 %v402_v2  ;;  %v1039_v8 = vld [vmem:[%s252_s8 + $0x20] sm:$0xff]  ;;  %279 = vst.msk [vmem:[#allocation2 + $0x4] sm:$0xff] %vm278_vm1, %v1035_v6  ;;  %280 = vst.msk [vmem:[#allocation2 + $0xc] sm:$0xff] %vm278_vm1, %v1037_v7  ;;  %v1045_v9 = vld [vmem:[%s252_s8 + $0x28] sm:$0xff] }
  0x11   : > { %837 = vmatprep.subr.mxu0 %v401_v3  ;;  %871 = vmatprep.subr.mxu1 %v401_v3  ;;  %283 = vst.msk [vmem:[#allocation2 + $0x24] sm:$0xff] %vm278_vm1, %v1039_v8  ;;  %v1051_v11 = vld [vmem:[%s252_s8 + $0x30] sm:$0xff]  ;;  %284 = vst.msk [vmem:[#allocation2 + $0x2c] sm:$0xff] %vm278_vm1, %v1045_v9  ;;  %v1061_v13 = vld [vmem:[%s252_s8 + $0x38] sm:$0xff] }
  0x12   : > { %838 = vmatpush3.msra.mxu0 %v401_v3  ;;  %883 = vmatpush3.msra.mxu1 %v401_v3  ;;  %282 = vst.msk [vmem:[#allocation2 + $0x1c] sm:$0xff] %vm278_vm1, %v1049_v10  ;;  %285 = vst.msk [vmem:[#allocation2 + $0x34] sm:$0xff] %vm278_vm1, %v1051_v11  ;;  %v1059_v12 = vld [vmem:[%s252_s8 + $0x10] sm:$0xff]  ;;  %v395_v19 = vld [vmem:[%s1235_s1 + $0x18] sm:$0xff] }
  0x13   : > { %839 = vmatprep.subr.mxu0 %v400_v4  ;;  %872 = vmatprep.subr.mxu1 %v400_v4  ;;  %281 = vst.msk [vmem:[#allocation2 + $0x14] sm:$0xff] %vm278_vm1, %v1059_v12  ;;  %286 = vst.msk [vmem:[#allocation2 + $0x3c] sm:$0xff] %vm278_vm1, %v1061_v13  ;;  %v394_v22 = vld [vmem:[%s1235_s1 + $0x10] sm:$0xff]  ;;  %v393_v27 = vld [vmem:[%s1235_s1 + $0x8] sm:$0xff] }
  0x14   : > { %840 = vmatpush3.msra.mxu0 %v400_v4  ;;  %884 = vmatpush3.msra.mxu1 %v400_v4  ;;  %v392_v28 = vld [vmem:[%s1235_s1] sm:$0xff] }
  0x15   : > { %841 = vmatprep.subr.mxu0 %v399_v5  ;;  %873 = vmatprep.subr.mxu1 %v399_v5 }
  0x16   : > { %842 = vmatpush3.msra.mxu0 %v399_v5  ;;  %885 = vmatpush3.msra.mxu1 %v399_v5 }
  0x17   : > { %843 = vmatprep.subr.mxu0 %v398_v14  ;;  %874 = vmatprep.subr.mxu1 %v398_v14  ;;  %v296_v17 = vld [vmem:[#allocation2 + $0xa] sm:$0xff]  ;;  %v295_v18 = vld [vmem:[#allocation2 + $0x2] sm:$0xff] }
  0x18   : > { %844 = vmatpush3.msra.mxu0 %v398_v14  ;;  %886 = vmatpush3.msra.mxu1 %v398_v14  ;;  %v300_v20 = vld [vmem:[#allocation2 + $0x2a] sm:$0xff]  ;;  %v287_v26 = vld [vmem:[#allocation2] sm:$0xff] }
  0x19   : > { %845 = vmatprep.subr.mxu0 %v397_v15  ;;  %875 = vmatprep.subr.mxu1 %v397_v15  ;;  %v299_v21 = vld [vmem:[#allocation2 + $0x22] sm:$0xff]  ;;  %v308_v29 = vld [vmem:[#allocation2 + $0x2c] sm:$0xff]  ;;  %v309_v35 = vld [vmem:[#allocation2 + $0x34] sm:$0xff] }
  0x1a   : > { %846 = vmatpush3.msra.mxu0 %v397_v15  ;;  %887 = vmatpush3.msra.mxu1 %v397_v15  ;;  %v699_v23 = vld [vmem:[#allocation2 + $0x40] sm:$0xf]  ;;  %v307_v24 = vld [vmem:[#allocation2 + $0x24] sm:$0xff]  ;;  %v304_v30 = vld [vmem:[#allocation2 + $0xc] sm:$0xff] }
  0x1b   : > { %321 = vrot.lane.b32.xlu1 %v296_v17, %s961_s17  ;;  %319 = vrot.lane.b32.xlu0 %v295_v18, %s961_s17  ;;  %v303_v25 = vld [vmem:[#allocation2 + $0x4] sm:$0xff]  ;;  %701 = vst.msk [vmem:[#allocation2] sm:$0xf] %vm268_vm0, %v699_v23  ;;  %v301_v31 = vld [vmem:[#allocation2 + $0x32] sm:$0xff]  ;;  %v302_v33 = vld [vmem:[#allocation2 + $0x3a] sm:$0xff] }
  0x1c   : > { %847 = vmatprep.subr.mxu0 %v396_v16  ;;  %876 = vmatprep.subr.mxu1 %v396_v16  ;;  %v297_v32 = vld [vmem:[#allocation2 + $0x12] sm:$0xff]  ;;  %v298_v34 = vld [vmem:[#allocation2 + $0x1a] sm:$0xff]  ;;  %v292_v44 = vld [vmem:[#allocation2 + $0x28] sm:$0xff] }
  0x1d   : > { %848 = vmatpush3.msra.mxu0 %v396_v16  ;;  %888 = vmatpush3.msra.mxu1 %v396_v16  ;;  %v305_v36 = vld [vmem:[#allocation2 + $0x14] sm:$0xff]  ;;  %v310_v37 = vld [vmem:[#allocation2 + $0x3c] sm:$0xff]  ;;  %v288_v49 = vld [vmem:[#allocation2 + $0x8] sm:$0xff] }
  0x1e   : > { %849 = vmatprep.subr.mxu0 %v395_v19  ;;  %877 = vmatprep.subr.mxu1 %v395_v19  ;;  %v306_v38 = vld [vmem:[#allocation2 + $0x1c] sm:$0xff]  ;;  %v293_v60 = vld [vmem:[#allocation2 + $0x30] sm:$0xff] }
  0x1f   : > { %329 = vrot.lane.b32.xlu1 %v300_v20, %s961_s17  ;;  %327 = vrot.lane.b32.xlu0 %v299_v21, %s961_s17  ;;  %v291_v43 = vld [vmem:[#allocation2 + $0x20] sm:$0xff]  ;;  %v289_v63 = vld [vmem:[#allocation2 + $0x10] sm:$0xff]  ;;  %v294_v1 = vld [vmem:[#allocation2 + $0x38] sm:$0xff] }
  0x20   : > { %850 = vmatpush3.msra.mxu0 %v395_v19  ;;  %889 = vmatpush3.msra.mxu1 %v395_v19  ;;  %v290_v5 = vld [vmem:[#allocation2 + $0x18] sm:$0xff] }
  0x21   : > { %851 = vmatprep.subr.mxu0 %v394_v22  ;;  %878 = vmatprep.subr.mxu1 %v394_v22 }
  0x22   : > { %852 = vmatpush3.msra.mxu0 %v394_v22  ;;  %890 = vmatpush3.msra.mxu1 %v394_v22  ;;  %v798_v22 = vld [vmem:[%s1236_s2] ss:$0 sm:$0xff] }
  0x23   : > { %359 = vrot.lane.b32.xlu1 %v307_v24, %s962_s29  ;;  %351 = vrot.lane.b32.xlu0 %v303_v25, %s962_s29 }
  0x24   : > { %853 = vmatprep.subr.mxu0 %v393_v27  ;;  %879 = vmatprep.subr.mxu1 %v393_v27 }
  0x25   : > { %854 = vmatpush3.msra.mxu0 %v393_v27  ;;  %891 = vmatpush3.msra.mxu1 %v393_v27 }
  0x26   : > { %855 = vmatprep.subr.mxu0 %v392_v28  ;;  %880 = vmatprep.subr.mxu1 %v392_v28 }
  0x27   : > { %361 = vrot.lane.b32.xlu1 %v308_v29, %s962_s29  ;;  %353 = vrot.lane.b32.xlu0 %v304_v30, %s962_s29 }
  0x28   : > { %856 = vmatpush3.msra.mxu0 %v392_v28  ;;  %892 = vmatpush3.msra.mxu1 %v392_v28 }
  0x2b   : > { %331 = vrot.lane.b32.xlu1 %v301_v31, %s961_s17  ;;  %323 = vrot.lane.b32.xlu0 %v297_v32, %s961_s17 }
  0x2f   : > { %333 = vrot.lane.b32.xlu1 %v302_v33, %s961_s17  ;;  %325 = vrot.lane.b32.xlu0 %v298_v34, %s961_s17 }
  0x33   : > { %363 = vrot.lane.b32.xlu1 %v309_v35, %s962_s29  ;;  %355 = vrot.lane.b32.xlu0 %v305_v36, %s962_s29 }
  0x37   : > { %365 = vrot.lane.b32.xlu1 %v310_v37, %s962_s29  ;;  %357 = vrot.lane.b32.xlu0 %v306_v38, %s962_s29 }
  0x8d   : > { %v322_v39 = vpop.permute.xlu1 %321  ;;  %v320_v40 = vpop.permute.xlu0 %319 }
  0x8e   : > { %v375_v45 = vsel %vm278_vm1, %v287_v26, %v320_v40  ;;  %v376_v53 = vsel %vm278_vm1, %v288_v49, %v322_v39 }
  0x91   : > { %v330_v41 = vpop.permute.xlu1 %329  ;;  %v328_v42 = vpop.permute.xlu0 %327 }
  0x92   : > { %v379_v46 = vsel %vm278_vm1, %v291_v43, %v328_v42  ;;  %v380_v52 = vsel %vm278_vm1, %v292_v44, %v330_v41 }
  0x95   : > { %v360_v47 = vpop.permute.xlu1 %359  ;;  %v352_v48 = vpop.permute.xlu0 %351 }
  0x96   : > { %v384_v50 = vsel %vm383_vm2, %v375_v45, %v352_v48  ;;  %v388_v51 = vsel %vm383_vm2, %v379_v46, %v360_v47 }
  0x97   : > { %857 = vmatprep.mubr.msk.f32.mxu0 %vm411_vm3, %v384_v50  ;;  %863 = vmatprep.mubr.msk.f32.mxu1 %vm411_vm3, %v388_v51 }
  0x99   : > { %v362_v54 = vpop.permute.xlu1 %361  ;;  %v354_v55 = vpop.permute.xlu0 %353 }
  0x9a   : > { %v389_v56 = vsel %vm383_vm2, %v380_v52, %v362_v54  ;;  %v385_v57 = vsel %vm383_vm2, %v376_v53, %v354_v55 }
  0x9b   : > { %858 = vmatmul.mubr.msk.f32.vlgmr.msra.gmra.mxu0 %vm411_vm3, %v385_v57  ;;  %864 = vmatmul.mubr.msk.f32.vlgmr.msra.gmra.mxu1 %vm411_vm3, %v389_v56 }
  0x9d   : > { %v332_v58 = vpop.permute.xlu1 %331  ;;  %v324_v59 = vpop.permute.xlu0 %323 }
  0x9e   : > { %v381_v0 = vsel %vm278_vm1, %v293_v60, %v332_v58  ;;  %v377_v2 = vsel %vm278_vm1, %v289_v63, %v324_v59 }
  0xa1   : > { %v334_v61 = vpop.permute.xlu1 %333  ;;  %v326_v62 = vpop.permute.xlu0 %325 }
  0xa2   : > { %v382_v16 = vsel %vm278_vm1, %v294_v1, %v334_v61  ;;  %v378_v17 = vsel %vm278_vm1, %v290_v5, %v326_v62 }
  0xa5   : > { %v364_v3 = vpop.permute.xlu1 %363  ;;  %v356_v4 = vpop.permute.xlu0 %355 }
  0xa6   : > { %v390_v14 = vsel %vm383_vm2, %v381_v0, %v364_v3  ;;  %v386_v15 = vsel %vm383_vm2, %v377_v2, %v356_v4 }
  0xa7   : > { %860 = vmatprep.mubr.msk.f32.mxu0 %vm411_vm3, %v386_v15  ;;  %866 = vmatprep.mubr.msk.f32.mxu1 %vm411_vm3, %v390_v14 }
  0xa9   : > { %v366_v18 = vpop.permute.xlu1 %365  ;;  %v358_v19 = vpop.permute.xlu0 %357 }
  0xaa   : > { %v391_v20 = vsel %vm383_vm2, %v382_v16, %v366_v18  ;;  %v387_v21 = vsel %vm383_vm2, %v378_v17, %v358_v19 }
  0xab   : > { %861 = vmatmul.mubr.msk.f32.gmra.mxu0 %vm411_vm3, %v387_v21  ;;  %867 = vmatmul.mubr.msk.f32.gmra.mxu1 %vm411_vm3, %v391_v20 }
 0x15b   : > { %v859_v23 = vpop.f32.mrf.mxu0  ;;  %v865_v24 = vpop.f32.mrf.mxu1 }
 0x15c   : > { %v508_v25 = vadd.f32 %v859_v23, %v798_v22  ;;  %v528_v26 = vadd.f32 %v865_v24, %v798_v22 }
 0x15d   : > { %v502_v27 = vpop.f32.mrf.mxu0  ;;  %v522_v28 = vpop.f32.mrf.mxu1 }
 0x15e   : > { %v503_v29 = vadd.f32 %v798_v22, %v502_v27  ;;  %v523_v30 = vadd.f32 %v798_v22, %v522_v28  ;;  %v556_v31 = vsel %vm278_vm1, %v528_v26, 0.0  ;;  %v544_v32 = vsel %vm278_vm1, %v508_v25, 0.0 }
 0x15f   : > { %557 = vadd.xlane.f32.xlu0 %v556_v31  ;;  %545 = vadd.xlane.f32.xlu1 %v544_v32 }
 0x160   : > { %v553_v33 = vsel %vm278_vm1, %v523_v30, 0.0  ;;  %v541_v34 = vsel %vm278_vm1, %v503_v29, 0.0 }
 0x163   : > { %554 = vadd.xlane.f32.xlu1 %v553_v33  ;;  %542 = vadd.xlane.f32.xlu0 %v541_v34 }
 0x16b   : > { %v862_v35 = vpop.f32.mrf.mxu0  ;;  %v868_v36 = vpop.f32.mrf.mxu1 }
 0x16c   : > { %v518_v37 = vadd.f32 %v862_v35, %v798_v22  ;;  %v538_v44 = vadd.f32 %v868_v36, %v798_v22 }
 0x16d   : > { %v512_v38 = vpop.f32.mrf.mxu0  ;;  %v532_v39 = vpop.f32.mrf.mxu1 }
 0x16e   : > { %v513_v40 = vadd.f32 %v798_v22, %v512_v38  ;;  %v533_v41 = vadd.f32 %v798_v22, %v532_v39  ;;  %v550_v42 = vsel %vm278_vm1, %v518_v37, 0.0  ;;  %v562_v46 = vsel %vm278_vm1, %v538_v44, 0.0 }
 0x16f   : > { %551 = vadd.xlane.f32.xlu0 %v550_v42 }
 0x170   : > { %v559_v43 = vsel %vm278_vm1, %v533_v41, 0.0  ;;  %v547_v45 = vsel %vm278_vm1, %v513_v40, 0.0 }
 0x171   : > { %560 = vadd.xlane.f32.xlu1 %v559_v43 }
 0x173   : > { %548 = vadd.xlane.f32.xlu0 %v547_v45 }
 0x177   : > { %563 = vadd.xlane.f32.xlu0 %v562_v46  ;;  %v807_v46 = vld [vmem:[%s1237_s3] ss:$0 sm:$0xff] }
 0x1e8   : > { %v558_v47 = vpop.xlane.xlu0 %557  ;;  %v546_v48 = vpop.xlane.xlu1 %545 }
 0x1e9   : > { %v570_v49 = vmul.f32 0.03125, %v558_v47  ;;  %v566_v50 = vmul.f32 0.03125, %v546_v48 }
 0x1eb   : > { %v1140_v51 = vsub.f32 %v528_v26, %v570_v49  ;;  %v1142_v52 = vsub.f32 %v508_v25, %v566_v50  ;;  %v808_v49 = vld [vmem:[%s1238_s4] ss:$0 sm:$0xff] }
 0x1ec   : > { %v555_v53 = vpop.xlane.xlu1 %554  ;;  %v543_v54 = vpop.xlane.xlu0 %542 }
 0x1ed   : > { %v569_v55 = vmul.f32 0.03125, %v555_v53  ;;  %v565_v56 = vmul.f32 0.03125, %v543_v54  ;;  %v582_v57 = vmul.f32 %v1142_v52, %v1142_v52  ;;  %v586_v61 = vmul.f32 %v1140_v51, %v1140_v51 }
 0x1ef   : > { %v1146_v58 = vsub.f32 %v523_v30, %v569_v55  ;;  %v1148_v59 = vsub.f32 %v503_v29, %v565_v56  ;;  %v592_v60 = vsel %vm278_vm1, %v582_v57, 0.0  ;;  %v604_v63 = vsel %vm278_vm1, %v586_v61, 0.0 }
 0x1f0   : > { %593 = vadd.xlane.f32.xlu0 %v592_v60 }
 0x1f1   : > { %v581_v62 = vmul.f32 %v1148_v59, %v1148_v59  ;;  %v585_v1 = vmul.f32 %v1146_v58, %v1146_v58 }
 0x1f3   : > { %v589_v0 = vsel %vm278_vm1, %v581_v62, 0.0  ;;  %v601_v2 = vsel %vm278_vm1, %v585_v1, 0.0 }
 0x1f4   : > { %605 = vadd.xlane.f32.xlu0 %v604_v63  ;;  %590 = vadd.xlane.f32.xlu1 %v589_v0 }
 0x1f8   : > { %602 = vadd.xlane.f32.xlu1 %v601_v2  ;;  %v552_v3 = vpop.xlane.xlu0 %551 }
 0x1f9   : > { %v568_v4 = vmul.f32 0.03125, %v552_v3 }
 0x1fa   : > { %v561_v5 = vpop.xlane.xlu1 %560 }
 0x1fb   : > { %v1160_v14 = vsub.f32 %v518_v37, %v568_v4  ;;  %v571_v15 = vmul.f32 0.03125, %v561_v5 }
 0x1fc   : > { %v549_v16 = vpop.xlane.xlu0 %548 }
 0x1fd   : > { %v567_v17 = vmul.f32 0.03125, %v549_v16  ;;  %v584_v18 = vmul.f32 %v1160_v14, %v1160_v14  ;;  %v1164_v19 = vsub.f32 %v533_v41, %v571_v15 }
 0x1ff   : > { %v1166_v20 = vsub.f32 %v513_v40, %v567_v17  ;;  %v598_v21 = vsel %vm278_vm1, %v584_v18, 0.0  ;;  %v587_v27 = vmul.f32 %v1164_v19, %v1164_v19 }
 0x200   : > { %599 = vadd.xlane.f32.xlu0 %v598_v21  ;;  %v564_v22 = vpop.xlane.xlu0 %563 }
 0x201   : > { %v572_v23 = vmul.f32 0.03125, %v564_v22  ;;  %v583_v24 = vmul.f32 %v1166_v20, %v1166_v20  ;;  %v607_v29 = vsel %vm278_vm1, %v587_v27, 0.0 }
 0x203   : > { %v1171_v25 = vsub.f32 %v538_v44, %v572_v23  ;;  %v595_v26 = vsel %vm278_vm1, %v583_v24, 0.0 }
 0x204   : > { %596 = vadd.xlane.f32.xlu1 %v595_v26 }
 0x205   : > { %v588_v28 = vmul.f32 %v1171_v25, %v1171_v25 }
 0x207   : > { %v610_v30 = vsel %vm278_vm1, %v588_v28, 0.0 }
 0x208   : > { %608 = vadd.xlane.f32.xlu1 %v607_v29  ;;  %611 = vadd.xlane.f32.xlu0 %v610_v30 }
 0x279   : > { %v594_v31 = vpop.xlane.xlu0 %593 }
 0x27a   : > { %v614_v32 = vmul.f32 0.03125, %v594_v31 }
 0x27c   : > { %v622_v33 = vadd.f32 1e-05, %v614_v32 }
 0x27d   : > { %v591_v34 = vpop.xlane.xlu1 %590  ;;  %v606_v35 = vpop.xlane.xlu0 %605 }
 0x27e   : > { %920 = vrsqrt.f32 %v622_v33  ;;  %v613_v36 = vmul.f32 0.03125, %v591_v34  ;;  %v618_v37 = vmul.f32 0.03125, %v606_v35 }
 0x280   : > { %v621_v38 = vadd.f32 1e-05, %v613_v36  ;;  %v626_v39 = vadd.f32 1e-05, %v618_v37 }
 0x281   : > { %v603_v40 = vpop.xlane.xlu1 %602 }
 0x282   : > { %922 = vrsqrt.f32 %v621_v38  ;;  %v617_v41 = vmul.f32 0.03125, %v603_v40 }
 0x283   : > { %924 = vrsqrt.f32 %v626_v39 }
 0x284   : > { %v625_v42 = vadd.f32 1e-05, %v617_v41 }
 0x286   : > { %926 = vrsqrt.f32 %v625_v42 }
 0x289   : > { %v600_v43 = vpop.xlane.xlu0 %599 }
 0x28a   : > { %v616_v44 = vmul.f32 0.03125, %v600_v43 }
 0x28b   : > { %v921_v45 = vpop.eup %920 }
 0x28c   : > { %v638_v47 = vmul.f32 %v921_v45, %v1142_v52  ;;  %v624_v48 = vadd.f32 1e-05, %v616_v44 }
 0x28d   : > { %v597_v50 = vpop.xlane.xlu1 %596 }
 0x28e   : > { %v653_v53 = vmul.f32 %v807_v46, %v638_v47  ;;  %928 = vrsqrt.f32 %v624_v48  ;;  %v615_v54 = vmul.f32 0.03125, %v597_v50 }
 0x28f   : > { %v923_v55 = vpop.eup %922 }
 0x290   : > { %v925_v56 = vpop.eup %924  ;;  %v668_v57 = vadd.f32 %v808_v49, %v653_v53  ;;  %v637_v60 = vmul.f32 %v923_v55, %v1148_v59  ;;  %v623_v61 = vadd.f32 1e-05, %v615_v54 }
 0x291   : > { %v642_v62 = vmul.f32 %v925_v56, %v1140_v51  ;;  %v609_v63 = vpop.xlane.xlu1 %608  ;;  %v612_v52 = vpop.xlane.xlu0 %611 }
 0x292   : > { %v676_v0 = vmax.f32 %v668_v57, 0.0  ;;  %v652_v1 = vmul.f32 %v807_v46, %v637_v60  ;;  %930 = vrsqrt.f32 %v623_v61  ;;  %v619_v2 = vmul.f32 0.03125, %v609_v63 }
 0x293   : > { %v927_v3 = vpop.eup %926  ;;  %v657_v4 = vmul.f32 %v807_v46, %v642_v62  ;;  %v620_v5 = vmul.f32 0.03125, %v612_v52 }
 0x294   : > { %v684_v59 = vadd.f32 %v676_v0, %v1037_v7  ;;  %v667_v51 = vadd.f32 %v808_v49, %v652_v1  ;;  %v641_v15 = vmul.f32 %v927_v3, %v1146_v58  ;;  %v627_v16 = vadd.f32 1e-05, %v619_v2 }
 0x295   : > { %v672_v17 = vadd.f32 %v808_v49, %v657_v4  ;;  %v628_v18 = vadd.f32 1e-05, %v620_v5 }
 0x296   : > { %692 = vst.msk [vmem:[%s1194_s15 + $0x8] sm:$0xff] %vm278_vm1, %v684_v59  ;;  %v675_v21 = vmax.f32 %v667_v51, 0.0  ;;  %v656_v22 = vmul.f32 %v807_v46, %v641_v15  ;;  %932 = vrsqrt.f32 %v627_v16 }
 0x297   : > { %v680_v23 = vmax.f32 %v672_v17, 0.0  ;;  %934 = vrsqrt.f32 %v628_v18 }
 0x298   : > { %v683_v24 = vadd.f32 %v675_v21, %v1035_v6  ;;  %v671_v26 = vadd.f32 %v808_v49, %v656_v22 }
 0x299   : > { %v688_v7 = vadd.f32 %v680_v23, %v1045_v9 }
 0x29a   : > { %691 = vst.msk [vmem:[%s1194_s15] sm:$0xff] %vm278_vm1, %v683_v24  ;;  %v679_v58 = vmax.f32 %v671_v26, 0.0 }
 0x29b   : > { %v929_v27 = vpop.eup %928  ;;  %696 = vst.msk [vmem:[%s1194_s15 + $0x28] sm:$0xff] %vm278_vm1, %v688_v7 }
 0x29c   : > { %v687_v28 = vadd.f32 %v679_v58, %v1039_v8  ;;  %v640_v29 = vmul.f32 %v929_v27, %v1160_v14 }
 0x29e   : > { %695 = vst.msk [vmem:[%s1194_s15 + $0x20] sm:$0xff] %vm278_vm1, %v687_v28  ;;  %v655_v30 = vmul.f32 %v807_v46, %v640_v29 }
 0x29f   : > { %v931_v31 = vpop.eup %930 }
 0x2a0   : > { %v670_v32 = vadd.f32 %v808_v49, %v655_v30  ;;  %v639_v6 = vmul.f32 %v931_v31, %v1166_v20 }
 0x2a2   : > { %v678_v9 = vmax.f32 %v670_v32, 0.0  ;;  %v654_v33 = vmul.f32 %v807_v46, %v639_v6 }
 0x2a3   : > { %v933_v34 = vpop.eup %932 }
 0x2a4   : > { %v935_v35 = vpop.eup %934  ;;  %v686_v36 = vadd.f32 %v678_v9, %v1049_v10  ;;  %v669_v37 = vadd.f32 %v808_v49, %v654_v33  ;;  %v643_v8 = vmul.f32 %v933_v34, %v1164_v19 }
 0x2a5   : > { %v644_v14 = vmul.f32 %v935_v35, %v1171_v25 }
 0x2a6   : > { %694 = vst.msk [vmem:[%s1194_s15 + $0x18] sm:$0xff] %vm278_vm1, %v686_v36  ;;  %v677_v38 = vmax.f32 %v669_v37, 0.0  ;;  %v658_v39 = vmul.f32 %v807_v46, %v643_v8 }
 0x2a7   : > { %v659_v40 = vmul.f32 %v807_v46, %v644_v14 }
 0x2a8   : > { %v685_v20 = vadd.f32 %v677_v38, %v1059_v12  ;;  %v673_v41 = vadd.f32 %v808_v49, %v658_v39 }
 0x2a9   : > { %v674_v42 = vadd.f32 %v808_v49, %v659_v40 }
 0x2aa   : > { %693 = vst.msk [vmem:[%s1194_s15 + $0x10] sm:$0xff] %vm278_vm1, %v685_v20  ;;  %v681_v43 = vmax.f32 %v673_v41, 0.0 }
 0x2ab   : > { %v682_v10 = vmax.f32 %v674_v42, 0.0 }
 0x2ac   : > { %v689_v44 = vadd.f32 %v681_v43, %v1051_v11 }
 0x2ad   : > { %v690_v45 = vadd.f32 %v682_v10, %v1061_v13 }
 0x2ae   : > { %697 = vst.msk [vmem:[%s1194_s15 + $0x30] sm:$0xff] %vm278_vm1, %v689_v44 }
 0x2af   : > { %698 = vst.msk [vmem:[%s1194_s15 + $0x38] sm:$0xff] %vm278_vm1, %v690_v45 }
 0x2b0 PF: > { %s15_s20 = sadd.s32 1, %s958_s20   ;;  %s1240_s18 = smov %s954_s19 }
 0x2b1   : > { %p12_p5 = scmp.ge.s32.totalorder %s15_s20, 4   ;;  %s1241_s19 = smov %s1243_s21 }
 0x2b3   :  { %14 = sbr.rel (!%p12_p5) target bundleno = 2 (0x2), region = 74 }

</bundles_post_ra>
